<compile_context>
chip_gen: v6e
topology: v6e:2x2x1
jax: 0.10.0
libtpu: 0.0.40
codegen_flags: <defaults>
</compile_context>

<pallas_src>
import jax
import jax.numpy as jnp
from jax.experimental import pallas as pl
from jax.experimental.pallas import tpu as pltpu


def _round_up(n, m):
    return ((n + m - 1) // m) * m


def _make_dqn_kernel(dot_dtype):
    def kernel(x_ref, w1_ref, b1_ref, w2_ref, b2_ref, w3_ref, b3_ref, o_ref):
        def dot(a, b):
            return jnp.dot(a.astype(dot_dtype), b.astype(dot_dtype),
                           preferred_element_type=jnp.float32)

        # fc1 -> ReLU  (bias add / ReLU in f32; accumulation always f32)
        h1 = jnp.maximum(dot(x_ref[...], w1_ref[...]) + b1_ref[...], 0.0)
        # fc2 -> ReLU
        h2 = jnp.maximum(dot(h1, w2_ref[...]) + b2_ref[...], 0.0)
        # fc3 (no activation); output block is already lane-exact (A columns).
        o_ref[...] = (dot(h2, w3_ref[...]) + b3_ref[...]).astype(o_ref.dtype)

    return kernel


def dqn_forward(x, params, *, tb=4096, dot_dtype=jnp.float32):
    """x: (batch, state_size) f32.  params: (w1, b1, w2, b2, w3, b3) with
    weights stored (in_features, out_features) and biases (1, out_features)."""
    w1, b1, w2, b2, w3, b3 = params
    state_size, hidden_size = w1.shape
    action_size = w3.shape[1]
    batch = x.shape[0]

    # ---- choose the batch tile ---------------------------------------------
    # Sublane alignment: 8 rows for f32 operands, 16 for bf16 (packed tiles).
    sub = 8 * max(1, 4 // jnp.dtype(dot_dtype).itemsize)
    tb = max(sub, _round_up(int(tb), sub))       # defensive rounding (tb=100 ok)
    tb = min(tb, _round_up(batch, sub))          # never bigger than the batch
    if batch >= 4 * sub:
        # Keep >= 4 grid steps for replay-sized batches: v7x shards the
        # "parallel" axis across 2 TensorCores and each core double-buffers.
        tb = min(tb, max(sub, _round_up(pl.cdiv(batch, 4), sub)))

    batch_pad = _round_up(batch, tb)
    if batch_pad != batch:
        x = jnp.pad(x, ((0, batch_pad - batch), (0, 0)))
    grid = (batch_pad // tb,)

    # Cast matmul operands once, outside the grid loop (halves x DMA for bf16).
    x_in = x.astype(dot_dtype)
    w1c = w1.astype(dot_dtype)
    w2c = w2.astype(dot_dtype)
    w3c = w3.astype(dot_dtype)
    operands = (x_in, w1c, b1, w2c, b2, w3c, b3)

    flops = 2 * batch_pad * (state_size * hidden_size
                             + hidden_size * hidden_size
                             + hidden_size * action_size)
    bytes_accessed = (sum(int(a.size) * a.dtype.itemsize for a in operands)
                      + batch_pad * action_size * 4)

    const = lambda i: (0, 0)   # weights/biases: VMEM-resident across steps

    out_padded = pl.pallas_call(
        _make_dqn_kernel(dot_dtype),
        out_shape=jax.ShapeDtypeStruct((batch_pad, action_size), jnp.float32),
        grid=grid,
        in_specs=[
            pl.BlockSpec((tb, state_size), lambda i: (i, 0)),
            pl.BlockSpec(w1c.shape, const),
            pl.BlockSpec(b1.shape, const),
            pl.BlockSpec(w2c.shape, const),
            pl.BlockSpec(b2.shape, const),
            pl.BlockSpec(w3c.shape, const),
            pl.BlockSpec(b3.shape, const),
        ],
        # Output block last dim == full array dim (action_size): legal per the
        # BlockSpec rule and avoids any 128-lane padding on the HBM writeback.
        out_specs=pl.BlockSpec((tb, action_size), lambda i: (i, 0)),
        compiler_params=pltpu.CompilerParams(
            dimension_semantics=("parallel",),
            vmem_limit_bytes=32 * 1024 * 1024),
        cost_estimate=pl.CostEstimate(flops=flops, transcendentals=0,
                                      bytes_accessed=bytes_accessed),
    )(*operands)

    # Only padded *rows* may exist (bias-only garbage); slicing them is a cheap
    # A-column-wide copy, not a full pass over a 128-lane padded array.
    return out_padded if batch_pad == batch else out_padded[:batch]


def init_params(key, state_size, action_size, hidden_size=64):
    """Deterministic init mimicking PyTorch nn.Linear (uniform +-1/sqrt(fan_in))."""
    ks = jax.random.split(key, 6)

    def linear(kw, kb, fan_in, fan_out):
        bound = 1.0 / jnp.sqrt(fan_in)
        w = jax.random.uniform(kw, (fan_in, fan_out), jnp.float32, -bound, bound)
        b = jax.random.uniform(kb, (1, fan_out), jnp.float32, -bound, bound)
        return w, b

    w1, b1 = linear(ks[0], ks[1], state_size, hidden_size)
    w2, b2 = linear(ks[2], ks[3], hidden_size, hidden_size)
    w3, b3 = linear(ks[4], ks[5], hidden_size, action_size)
    return (w1, b1, w2, b2, w3, b3)


def _reference(x, params):
    w1, b1, w2, b2, w3, b3 = params
    h = jnp.maximum(x @ w1 + b1, 0.0)
    h = jnp.maximum(h @ w2 + b2, 0.0)
    return h @ w3 + b3


if __name__ == "__main__":
    key = jax.random.PRNGKey(0)
    k_x, k_x2, k_p = jax.random.split(key, 3)

    state_size = 16
    action_size = 4
    hidden_size = 64
    params = init_params(k_p, state_size, action_size, hidden_size)

    # 1) Small inference-style batch (single grid step), exact f32 path.
    batch = 8
    x = jax.random.normal(k_x, (batch, state_size), dtype=jnp.float32)
    out = jax.block_until_ready(dqn_forward(x, params))
    ref = _reference(x, params)
    assert out.shape == (batch, action_size)
    assert jnp.allclose(out, ref, atol=1e-5, rtol=1e-5)

    # 2) Replay-style batch exercising the batch grid + row-padding path.
    #    Requested tb=128 is clamped so the grid keeps >= 4 steps (tb -> 80).
    batch2 = 300
    x2 = jax.random.normal(k_x2, (batch2, state_size), dtype=jnp.float32)
    out2 = jax.block_until_ready(dqn_forward(x2, params, tb=128))
    ref2 = _reference(x2, params)
    assert out2.shape == (batch2, action_size)
    assert jnp.allclose(out2, ref2, atol=1e-5, rtol=1e-5)

    # 3) bf16-operand path (the perf-recommended configuration for v5e/v6e):
    #    same semantics, relaxed tolerance since MXU operands are bf16.
    out3 = jax.block_until_ready(
        dqn_forward(x2, params, tb=128, dot_dtype=jnp.bfloat16))
    assert out3.shape == (batch2, action_size)
    assert jnp.allclose(out3, ref2, atol=1e-1, rtol=1e-1)

    print("KERNEL_OK")
</pallas_src>

<mosaic_0001>
module attributes {stable_mosaic.version = 11 : i64} {
  func.func @kernel(%arg0: i32, %arg1: memref<8x16xf32, #tpu.memory_space<vmem>>, %arg2: memref<16x64xf32, #tpu.memory_space<vmem>>, %arg3: memref<1x64xf32, #tpu.memory_space<vmem>>, %arg4: memref<64x64xf32, #tpu.memory_space<vmem>>, %arg5: memref<1x64xf32, #tpu.memory_space<vmem>>, %arg6: memref<64x4xf32, #tpu.memory_space<vmem>>, %arg7: memref<1x4xf32, #tpu.memory_space<vmem>>, %arg8: memref<8x4xf32, #tpu.memory_space<vmem>>) attributes {dimension_semantics = [#tpu.dimension_semantics<parallel>], iteration_bounds = array<i64: 1>, scalar_prefetch = 0 : i64, scratch_operands = 0 : i64, tpu.core_type = #tpu.core_type<tc>, window_params = [{transform_indices = @transform_0, window_bounds = array<i64: 8, 16>}, {pipeline_mode = #tpu.pipeline_mode<synchronous>, transform_indices = @transform_1, window_bounds = array<i64: 16, 64>}, {pipeline_mode = #tpu.pipeline_mode<synchronous>, transform_indices = @transform_2, window_bounds = array<i64: 1, 64>}, {pipeline_mode = #tpu.pipeline_mode<synchronous>, transform_indices = @transform_3, window_bounds = array<i64: 64, 64>}, {pipeline_mode = #tpu.pipeline_mode<synchronous>, transform_indices = @transform_4, window_bounds = array<i64: 1, 64>}, {pipeline_mode = #tpu.pipeline_mode<synchronous>, transform_indices = @transform_5, window_bounds = array<i64: 64, 4>}, {pipeline_mode = #tpu.pipeline_mode<synchronous>, transform_indices = @transform_6, window_bounds = array<i64: 1, 4>}, {transform_indices = @transform_7, window_bounds = array<i64: 8, 4>}]} {
    %c0 = arith.constant 0 : index
    %c0_0 = arith.constant 0 : index
    %0 = vector.load %arg1[%c0, %c0_0] : memref<8x16xf32, #tpu.memory_space<vmem>>, vector<8x16xf32>
    %c0_1 = arith.constant 0 : index
    %c0_2 = arith.constant 0 : index
    %1 = vector.load %arg2[%c0_1, %c0_2] : memref<16x64xf32, #tpu.memory_space<vmem>>, vector<16x64xf32>
    %cst = arith.constant dense<0.000000e+00> : vector<8x64xf32>
    %2 = tpu.matmul %0, %1, %cst {dimension_numbers = #tpu.dot_dimension_numbers<[1], [0], [0], [1], [0, 0, 1, 1], [], []>} : vector<8x16xf32>, vector<16x64xf32>, vector<8x64xf32> -> vector<8x64xf32>
    %c0_3 = arith.constant 0 : index
    %c0_4 = arith.constant 0 : index
    %3 = vector.load %arg3[%c0_3, %c0_4] : memref<1x64xf32, #tpu.memory_space<vmem>>, vector<1x64xf32>
    %4 = vector.broadcast %3 : vector<1x64xf32> to vector<8x64xf32>
    %5 = arith.addf %2, %4 : vector<8x64xf32>
    %cst_5 = arith.constant 0.000000e+00 : f32
    %6 = vector.broadcast %cst_5 : f32 to vector<8x64xf32>
    %7 = arith.maximumf %5, %6 : vector<8x64xf32>
    %c0_6 = arith.constant 0 : index
    %c0_7 = arith.constant 0 : index
    %8 = vector.load %arg4[%c0_6, %c0_7] : memref<64x64xf32, #tpu.memory_space<vmem>>, vector<64x64xf32>
    %cst_8 = arith.constant dense<0.000000e+00> : vector<8x64xf32>
    %9 = tpu.matmul %7, %8, %cst_8 {dimension_numbers = #tpu.dot_dimension_numbers<[1], [0], [0], [1], [0, 0, 1, 1], [], []>} : vector<8x64xf32>, vector<64x64xf32>, vector<8x64xf32> -> vector<8x64xf32>
    %c0_9 = arith.constant 0 : index
    %c0_10 = arith.constant 0 : index
    %10 = vector.load %arg5[%c0_9, %c0_10] : memref<1x64xf32, #tpu.memory_space<vmem>>, vector<1x64xf32>
    %11 = vector.broadcast %10 : vector<1x64xf32> to vector<8x64xf32>
    %12 = arith.addf %9, %11 : vector<8x64xf32>
    %cst_11 = arith.constant 0.000000e+00 : f32
    %13 = vector.broadcast %cst_11 : f32 to vector<8x64xf32>
    %14 = arith.maximumf %12, %13 : vector<8x64xf32>
    %c0_12 = arith.constant 0 : index
    %c0_13 = arith.constant 0 : index
    %15 = vector.load %arg6[%c0_12, %c0_13] : memref<64x4xf32, #tpu.memory_space<vmem>>, vector<64x4xf32>
    %cst_14 = arith.constant dense<0.000000e+00> : vector<8x4xf32>
    %16 = tpu.matmul %14, %15, %cst_14 {dimension_numbers = #tpu.dot_dimension_numbers<[1], [0], [0], [1], [0, 0, 1, 1], [], []>} : vector<8x64xf32>, vector<64x4xf32>, vector<8x4xf32> -> vector<8x4xf32>
    %c0_15 = arith.constant 0 : index
    %c0_16 = arith.constant 0 : index
    %17 = vector.load %arg7[%c0_15, %c0_16] : memref<1x4xf32, #tpu.memory_space<vmem>>, vector<1x4xf32>
    %18 = vector.broadcast %17 : vector<1x4xf32> to vector<8x4xf32>
    %19 = arith.addf %16, %18 : vector<8x4xf32>
    %c0_17 = arith.constant 0 : index
    %c0_18 = arith.constant 0 : index
    %20 = vector.load %arg8[%c0_17, %c0_18] : memref<8x4xf32, #tpu.memory_space<vmem>>, vector<8x4xf32>
    tpu.vector_store %arg8[%c0_17, %c0_18], %19 {strides = array<i32>} : memref<8x4xf32, #tpu.memory_space<vmem>>, vector<8x4xf32>,
    return
  }
  func.func @transform_0(%arg0: i32) -> (i32, i32) {
    %c0_i32 = arith.constant 0 : i32
    %c0_i32_0 = arith.constant 0 : i32
    return %arg0, %c0_i32 : i32, i32
  }
  func.func @transform_1(%arg0: i32) -> (i32, i32) {
    %c0_i32 = arith.constant 0 : i32
    %c0_i32_0 = arith.constant 0 : i32
    %c0_i32_1 = arith.constant 0 : i32
    return %c0_i32, %c0_i32_0 : i32, i32
  }
  func.func @transform_2(%arg0: i32) -> (i32, i32) {
    %c0_i32 = arith.constant 0 : i32
    %c0_i32_0 = arith.constant 0 : i32
    %c0_i32_1 = arith.constant 0 : i32
    return %c0_i32, %c0_i32_0 : i32, i32
  }
  func.func @transform_3(%arg0: i32) -> (i32, i32) {
    %c0_i32 = arith.constant 0 : i32
    %c0_i32_0 = arith.constant 0 : i32
    %c0_i32_1 = arith.constant 0 : i32
    return %c0_i32, %c0_i32_0 : i32, i32
  }
  func.func @transform_4(%arg0: i32) -> (i32, i32) {
    %c0_i32 = arith.constant 0 : i32
    %c0_i32_0 = arith.constant 0 : i32
    %c0_i32_1 = arith.constant 0 : i32
    return %c0_i32, %c0_i32_0 : i32, i32
  }
  func.func @transform_5(%arg0: i32) -> (i32, i32) {
    %c0_i32 = arith.constant 0 : i32
    %c0_i32_0 = arith.constant 0 : i32
    %c0_i32_1 = arith.constant 0 : i32
    return %c0_i32, %c0_i32_0 : i32, i32
  }
  func.func @transform_6(%arg0: i32) -> (i32, i32) {
    %c0_i32 = arith.constant 0 : i32
    %c0_i32_0 = arith.constant 0 : i32
    %c0_i32_1 = arith.constant 0 : i32
    return %c0_i32, %c0_i32_0 : i32, i32
  }
  func.func @transform_7(%arg0: i32) -> (i32, i32) {
    %c0_i32 = arith.constant 0 : i32
    %c0_i32_0 = arith.constant 0 : i32
    return %arg0, %c0_i32 : i32, i32
  }
}

</mosaic_0001>

<bundles_post_ra>
// kernel: tpu_custom_call.1
= control target key start
LH: loop header
LB: loop body
LE: loop exit
PB: predicated region body
PF: predicated region fallthrough
CT: control target
= control target key end

     0   :  { %12 = vsyncpa [#allocation3], 0  ;;  %s583_s0 = inlined_call_operand.vmem [shape: f32[8,16], index: 0, kind: input, shape index: {}]   ;;  %s584_s1 = inlined_call_operand.hbm [shape: f32[16,64], index: 1, kind: input, shape index: {}]   ;;  %s585_s2 = inlined_call_operand.vmem [shape: f32[1,64], index: 2, kind: input, shape index: {}]   ;;  %s586_s3 = inlined_call_operand.vmem [shape: f32[64,64], index: 3, kind: input, shape index: {}]   ;;  %s587_s4 = inlined_call_operand.hbm [shape: f32[1,64], index: 4, kind: input, shape index: {}]   ;;  %s588_s5 = inlined_call_operand.vmem [shape: f32[64,4], index: 5, kind: input, shape index: {}]   ;;  %s589_s6 = inlined_call_operand.vmem [shape: f32[1,4], index: 6, kind: input, shape index: {}]   ;;  %s590_s7 = inlined_call_operand.vmem [shape: f32[8,4], index: 7, kind: output, shape index: {}]  }
   0x1   :  { %13 = vsyncpa [#allocation5], 0  ;;  %s445_s24 = smov [#allocation2]  }
   0x2   :  { %s21_s25 = sshll.u32 %s445_s24, 4  ;;  %s22_s25 = int_to_ptr.vmem [resolvable:$true] %s21_s25 }
   0x3   :  { %s409_s26 = scalar_lea.vmem %s22_s25, 256  ;;  %p414_p1 = scmp.lt.s32.totalorder %s22_s25, %s22_s25 }
   0x4   :  { %p410_p0 = scmp.ne.s32.totalorder %s22_s25, %s409_s26  ;;  %p415_p2 = scmp.lt.s32.totalorder %s409_s26, %s409_s26 }
   0x6   :  { %p416_p3 = por %p415_p2, %p414_p1 }
   0x8   :  { %p417_p4 = pnand %p416_p3, %p410_p0 }
   0xa   :  { %420 = shalt.err (!%p417_p4)
}
   0xb   :  { %s446_s27 = smov 128   ;;  %s447_s28 = smov 8  }
   0xc   :  { %27 = dma.hbm_to_vmem [thread:$0]  %s584_s1, 256, %s22_s25, [#allocation3], %s446_s27, %s446_s27, %s447_s28  }
   0xd   :  { %s448_s8 = smov [#allocation4]  }
   0xe   :  { %s38_s9 = sshll.u32 %s448_s8, 4  ;;  %s39_s9 = int_to_ptr.vmem [resolvable:$true] %s38_s9 }
   0xf   :  { %s429_s10 = scalar_lea.vmem %s39_s9, 16  ;;  %s433_s11 = scalar_lea.vmem %s39_s9, 32 }
  0x10   :  { %p430_p5 = scmp.ne.s32.totalorder %s39_s9, %s429_s10  ;;  %p434_p6 = scmp.lt.s32.totalorder %s39_s9, %s39_s9 }
  0x11   :  { %p435_p7 = scmp.lt.s32.totalorder %s433_s11, %s429_s10 }
  0x13   :  { %p436_p8 = por %p435_p7, %p434_p6 }
  0x15   :  { %p437_p9 = pnand %p436_p8, %p430_p5 }
  0x17   :  { %440 = shalt.err (!%p437_p9)
}
  0x18   :  { %41 = dma.hbm_to_vmem [thread:$0]  %s587_s4, 16, %s39_s9, [#allocation5]  }
  0x19   :  { %441 = dma.done.wait [#allocation3], 256  }
  0x1a   :  { %442 = vsyncadd [#allocation3], 4294967040 }
  0x1b   :  { %443 = dma.done.wait [#allocation5], 16  }
  0x1c   :  { %444 = vsyncadd [#allocation5], 4294967280  ;;  %v449_v0 = vmov 0.0   ;;  %vm450_vm0 = vmmov 0   ;;  %v54_v1 = vld [vmem:[#allocation2 + $0x8] sm:$0xff]  ;;  %v53_v2 = vld [vmem:[#allocation2] sm:$0xff] }
  0x1d   :  { %350 = vmatprep.subr.mxu0 %v449_v0  ;;  %354 = vmatprep.mubr.msk.f32.mxu0 %vm450_vm0, %v449_v0  ;;  %v52_v3 = vld [vmem:[%s583_s0] sm:$0xff]  ;;  %vm62_vm1 = vcmask 130048   ;;  %v144_v4 = vld [vmem:[%s586_s3 + $0x38] sm:$0xff]  ;;  %v143_v5 = vld [vmem:[%s586_s3 + $0x30] sm:$0xff]  ;;  %vm152_vm2 = vcmask 523264   ;;  %vm315_vm3 = vcmask 31744  }
  0x1e   :  { %357 = vmatprep.subr.mxu1 %v449_v0  ;;  %373 = vmatprep.mubr.msk.f32.mxu1 %vm450_vm0, %v449_v0  ;;  %v142_v6 = vld [vmem:[%s586_s3 + $0x28] sm:$0xff]  ;;  %v141_v7 = vld [vmem:[%s586_s3 + $0x20] sm:$0xff]  ;;  %v140_v8 = vld [vmem:[%s586_s3 + $0x18] sm:$0xff] }
  0x1f   :  { %351 = vmatpush3.msra.mxu0 %v54_v1  ;;  %358 = vmatpush3.msra.mxu1 %v144_v4  ;;  %v139_v9 = vld [vmem:[%s586_s3 + $0x10] sm:$0xff]  ;;  %v138_v10 = vld [vmem:[%s586_s3 + $0x8] sm:$0xff]  ;;  %v137_v11 = vld [vmem:[%s586_s3] sm:$0xff] }
  0x20   :  { %352 = vmatprep.subr.mxu0 %v449_v0  ;;  %359 = vmatprep.subr.mxu1 %v449_v0  ;;  %v234_v12 = vld [vmem:[%s588_s5 + $0x38] sm:$0xff]  ;;  %v233_v13 = vld [vmem:[%s588_s5 + $0x30] sm:$0xff]  ;;  %v232_v14 = vld [vmem:[%s588_s5 + $0x28] sm:$0xff] }
  0x21   :  { %353 = vmatpush3.msra.mxu0 %v53_v2  ;;  %360 = vmatpush3.msra.mxu1 %v143_v5  ;;  %v231_v15 = vld [vmem:[%s588_s5 + $0x20] sm:$0xff]  ;;  %v230_v16 = vld [vmem:[%s588_s5 + $0x18] sm:$0xff]  ;;  %v229_v22 = vld [vmem:[%s588_s5 + $0x10] sm:$0xff] }
  0x22   :  { %355 = vmatmul.mubr.msk.f32.vlgmr.msra.gmra.mxu0 %vm62_vm1, %v52_v3  ;;  %361 = vmatprep.subr.mxu1 %v449_v0  ;;  %v323_v17 = vld [vmem:[%s585_s2] ss:$0 sm:$0xff]  ;;  %v228_v23 = vld [vmem:[%s588_s5 + $0x8] sm:$0xff]  ;;  %v325_v25 = vld [vmem:[#allocation4] ss:$0 sm:$0xff] }
  0x23   :  { %376 = vmatprep.subr.mxu0 %v449_v0  ;;  %362 = vmatpush3.msra.mxu1 %v142_v6  ;;  %v227_v24 = vld [vmem:[%s588_s5] sm:$0xff] }
  0x24   :  { %392 = vmatprep.mubr.msk.f32.mxu0 %vm450_vm0, %v449_v0  ;;  %363 = vmatprep.subr.mxu1 %v449_v0  ;;  %v327_v30 = vld [vmem:[%s589_s6] ss:$0 sm:$0xff] }
  0x25   :  { %364 = vmatpush3.msra.mxu1 %v141_v7  ;;  %377 = vmatpush3.msra.mxu0 %v234_v12 }
  0x26   :  { %365 = vmatprep.subr.mxu1 %v449_v0  ;;  %378 = vmatprep.subr.mxu0 %v449_v0 }
  0x27   :  { %366 = vmatpush3.msra.mxu1 %v140_v8  ;;  %379 = vmatpush3.msra.mxu0 %v233_v13 }
  0x28   :  { %367 = vmatprep.subr.mxu1 %v449_v0  ;;  %380 = vmatprep.subr.mxu0 %v449_v0 }
  0x29   :  { %368 = vmatpush3.msra.mxu1 %v139_v9  ;;  %381 = vmatpush3.msra.mxu0 %v232_v14 }
  0x2a   :  { %369 = vmatprep.subr.mxu1 %v449_v0  ;;  %382 = vmatprep.subr.mxu0 %v449_v0 }
  0x2b   :  { %370 = vmatpush3.msra.mxu1 %v138_v10  ;;  %383 = vmatpush3.msra.mxu0 %v231_v15 }
  0x2c   :  { %371 = vmatprep.subr.mxu1 %v449_v0  ;;  %384 = vmatprep.subr.mxu0 %v449_v0 }
  0x2d   :  { %372 = vmatpush3.msra.mxu1 %v137_v11  ;;  %385 = vmatpush3.msra.mxu0 %v230_v16 }
  0x2e   :  { %386 = vmatprep.subr.mxu0 %v449_v0 }
  0x2f   :  { %387 = vmatpush3.msra.mxu0 %v229_v22 }
  0x30   :  { %388 = vmatprep.subr.mxu0 %v449_v0 }
  0x31   :  { %389 = vmatpush3.msra.mxu0 %v228_v23 }
  0x32   :  { %390 = vmatprep.subr.mxu0 %v449_v0 }
  0x33   :  { %391 = vmatpush3.msra.mxu0 %v227_v24 }
  0xe2   :  { %v132_v18 = vpop.f32.mrf.mxu0 }
  0xe3   :  { %v133_v19 = vadd.f32 %v323_v17, %v132_v18 }
  0xe4   :  { %v356_v20 = vpop.f32.mrf.mxu0 }
  0xe5   :  { %v136_v21 = vmax.f32 %v133_v19, 0.0 }
  0xe7   :  { %374 = vmatmul.mubr.msk.f32.vlgmr.msra.gmra.mxu1 %vm152_vm2, %v136_v21 }
 0x1a7   :  { %v222_v26 = vpop.f32.mrf.mxu1 }
 0x1a8   :  { %v223_v27 = vadd.f32 %v325_v25, %v222_v26 }
 0x1a9   :  { %v375_v28 = vpop.f32.mrf.mxu1 }
 0x1aa   :  { %v226_v29 = vmax.f32 %v223_v27, 0.0 }
 0x1ac   :  { %393 = vmatmul.mubr.msk.f32.vlgmr.msra.gmra.mxu0 %vm152_vm2, %v226_v29 }
 0x26c   :  { %v311_v31 = vpop.f32.mrf.mxu0 }
 0x26d   :  { %v312_v32 = vadd.f32 %v327_v30, %v311_v31 }
 0x26e   :  { %v394_v33 = vpop.f32.mrf.mxu0 }
 0x26f   :  { %316 = vst.msk [vmem:[%s590_s7] sm:$0xff] %vm315_vm3, %v312_v32 }
 0x270   :  { %321 = vsyncpa [#allocation3], 1 }
 0x271   :  { %322 = vsyncpa [#allocation5], 1 }

</bundles_post_ra>
